<compile_context>
chip_gen: v6e
topology: v6e:2x2x1
jax: 0.10.0
libtpu: 0.0.40
codegen_flags: <defaults>
</compile_context>

<pallas_src>
import jax
import jax.numpy as jnp
from jax.experimental import pallas as pl
from jax.experimental.pallas import tpu as pltpu

_MIB = 1024 * 1024


# ---------------------------------------------------------------------------
# Kernels
# ---------------------------------------------------------------------------
def _temporal_kernel_resident(x_ref, t_ref, w1_ref, w2_ref, o_ref):
    """Weights fully resident in VMEM (single-buffered); 1-D grid over batch."""
    x = x_ref[...]                                            # native dtype [tb, F]
    h = jnp.dot(x.astype(w1_ref.dtype), w1_ref[...],
                preferred_element_type=jnp.float32)
    h = h + jnp.dot(t_ref[...].astype(w2_ref.dtype), w2_ref[...],
                    preferred_element_type=jnp.float32)
    out = jnp.maximum(h, 0.0)                                 # ReLU in f32
    # residual add with the ORIGINAL-precision x (torch semantics)
    o_ref[...] = (x.astype(jnp.float32) + out).astype(o_ref.dtype)


def _make_ntiled_kernel(tn):
    """F_out tiled on the OUTER grid axis: each weight column block streams
    through HBM exactly once; residual columns come from the already-loaded
    full-K x tile (no duplicate x input)."""
    def kernel(x_ref, t_ref, w1_ref, w2_ref, o_ref):
        j = pl.program_id(0)
        h = jnp.dot(x_ref[...].astype(w1_ref.dtype), w1_ref[...],
                    preferred_element_type=jnp.float32)
        h = h + jnp.dot(t_ref[...].astype(w2_ref.dtype), w2_ref[...],
                        preferred_element_type=jnp.float32)
        out = jnp.maximum(h, 0.0)
        col = pl.multiple_of(j * tn, 128)                     # lane-aligned VMEM slice
        xres = x_ref[:, pl.ds(col, tn)]                       # valid: F_in == F_out
        o_ref[...] = (xres.astype(jnp.float32) + out).astype(o_ref.dtype)
    return kernel


# ---------------------------------------------------------------------------
# Hardware / budgeting helpers
# ---------------------------------------------------------------------------
def _round_up(v, m):
    return ((v + m - 1) // m) * m


def _pad_rows(a, rows):
    return a if a.shape[0] == rows else jnp.pad(a, ((0, rows - a.shape[0]), (0, 0)))


def _pad_cols(a, cols):
    return a if a.shape[1] == cols else jnp.pad(a, ((0, 0), (0, cols - a.shape[1])))


def _vmem_limit_bytes():
    # Physical VMEM differs per generation (v5e/v6e: 128 MiB, v7x: 64 MiB per TC).
    cap = 64 * _MIB                            # conservative (v7x-sized) fallback
    try:
        info = pltpu.get_tpu_info()
        cap = int(getattr(info, "vmem_capacity_bytes", cap))
    except Exception:
        pass
    return min(cap * 3 // 4, 96 * _MIB)        # headroom for compiler scratch


def _num_tensorcores():
    """2 TensorCores per chip on v7x-class (and v3/v4 megacore); 1 on v5e/v6e."""
    try:
        kind = jax.devices()[0].device_kind.lower()
    except Exception:
        return 1
    return 2 if ("v7" in kind or "v4" in kind or "v3" in kind) else 1


def _pick_tn(f_in, f_out, t_feat, w_isz, a_isz, o_isz, budget, min_tb=256):
    """Output-feature tile.  Keep both weights fully resident whenever
    (weights + a modest min_tb-row activation working set) fits the budget;
    otherwise stream lane-dense multiples of 128 (largest that fits)."""
    act_in = 2 * min_tb * (f_in + t_feat) * a_isz            # double-buffered x, t
    if (f_in + t_feat) * f_out * w_isz + act_in + 2 * min_tb * f_out * o_isz <= budget:
        return f_out
    for tn in (2048, 1024, 512, 256, 128):
        if f_out % tn == 0:
            w_blk = (f_in + t_feat) * tn * w_isz              # single-buffered stream
            if w_blk + act_in + 2 * min_tb * tn * o_isz <= budget:
                return tn
    # No clean divisor / nothing fits: stream 128-wide blocks; wrapper pads F.
    return 128


def _pick_tb(batch, per_row_bytes, budget, want_split):
    """Batch tile: multiple of 8 (256-multiples preferred when multi-tile), as
    large as the VMEM budget allows; on 2-TensorCore chips prefer >=2 grid
    steps so the 'parallel' batch axis can be sharded across cores."""
    b8 = _round_up(batch, 8)
    max_rows = max(8, (budget // max(per_row_bytes, 1)) // 8 * 8)
    tb = min(b8, max_rows, 1024)
    if tb < b8:
        # multi-tile: keep tiles 256-aligned (MXU-friendly) when possible
        tb = (tb // 256) * 256 if tb >= 256 else max(8, (tb // 8) * 8)
    elif want_split and tb >= 512:
        # one tile would cover the whole batch: split it across 2 TensorCores
        tb = max(256, _round_up((b8 + 1) // 2, 8))
    return tb


# ---------------------------------------------------------------------------
# Public wrapper
# ---------------------------------------------------------------------------
def init_params_from_torch_layout(w1, w2, compute_dtype=jnp.bfloat16):
    """One-time parameter prep (at init, NOT per forward): torch Linear stores
    weight as [out, in]; the kernel wants [in, out] in the compute dtype."""
    return (jnp.asarray(w1).T.astype(compute_dtype),
            jnp.asarray(w2).T.astype(compute_dtype))


def temporal_layer(x, t_emb, w1_t, w2_t, *, block_n=None, block_b=None):
    """TemporalLayer forward: x + relu(x @ w1_t + t_emb @ w2_t).

    x:     [B, F]  activations (native dtype; cast to weight dtype in-kernel)
    t_emb: [B, T]  temporal embedding
    w1_t:  [F, F]  fc1 weight, pre-transposed to [in, out] (see init helper)
    w2_t:  [T, F]  enc weight, pre-transposed to [in, out]
    """
    B, F_in = x.shape
    Bt, T = t_emb.shape
    assert Bt == B
    F_out = w1_t.shape[1]
    assert w1_t.shape == (F_in, F_out)
    assert w2_t.shape == (T, F_out)
    assert F_in == F_out, "residual connection requires in_features == out_features"

    out_dtype = x.dtype
    w_isz = jnp.dtype(w1_t.dtype).itemsize
    a_isz = max(jnp.dtype(x.dtype).itemsize, jnp.dtype(t_emb.dtype).itemsize)
    o_isz = jnp.dtype(out_dtype).itemsize

    vmem_limit = _vmem_limit_bytes()
    budget = int(vmem_limit * 0.85)
    want_split = _num_tensorcores() >= 2

    if block_n is None:
        tn = _pick_tn(F_in, F_out, T, w_isz, a_isz, o_isz, budget)
    else:
        assert block_n == F_out or (F_out % block_n == 0 and block_n % 128 == 0)
        tn = block_n

    if tn == F_out:
        # ----- resident-weights path: 1-D grid over batch tiles --------------
        weight_bytes = (F_in + T) * F_out * w_isz            # single-buffered
        per_row = 2 * (F_in + T) * a_isz + 2 * F_out * o_isz
        tb = block_b or _pick_tb(B, per_row, budget - weight_bytes, want_split)
        Bp = _round_up(B, tb)
        out = pl.pallas_call(
            _temporal_kernel_resident,
            out_shape=jax.ShapeDtypeStruct((Bp, F_out), out_dtype),
            grid_spec=pltpu.PrefetchScalarGridSpec(
                num_scalar_prefetch=0,
                grid=(Bp // tb,),
                in_specs=[
                    pl.BlockSpec((tb, F_in), lambda i: (i, 0)),       # x tile
                    pl.BlockSpec((tb, T), lambda i: (i, 0)),          # t_emb tile
                    pl.BlockSpec((F_in, F_out), lambda i: (0, 0),     # w1^T resident
                                 pipeline_mode=pl.Buffered(1)),
                    pl.BlockSpec((T, F_out), lambda i: (0, 0),        # w2^T resident
                                 pipeline_mode=pl.Buffered(1)),
                ],
                out_specs=pl.BlockSpec((tb, F_out), lambda i: (i, 0)),
            ),
            compiler_params=pltpu.CompilerParams(
                dimension_semantics=("parallel",),
                vmem_limit_bytes=vmem_limit,
            ),
        )(_pad_rows(x, Bp), _pad_rows(t_emb, Bp), w1_t, w2_t)
        return out[:B] if Bp != B else out

    # ----- streamed path: F_out on the OUTER axis, batch on the inner --------
    Fp = _round_up(F_out, tn)          # != F_out only when no clean divisor fit
    xk, w1k, w2k = x, w1_t, w2_t
    if Fp != F_out:
        xk = _pad_cols(x, Fp)                        # residual slice needs the cols
        w1k = _pad_cols(_pad_rows(w1_t, Fp), Fp)
        w2k = _pad_cols(w2_t, Fp)
    F_p = Fp                                         # padded F_in == padded F_out
    nj = Fp // tn

    weight_bytes = (F_p + T) * tn * w_isz            # single-buffered column blocks
    per_row = 2 * (F_p + T) * a_isz + 2 * tn * o_isz
    tb = block_b or _pick_tb(B, per_row, budget - weight_bytes, want_split)
    Bp = _round_up(B, tb)

    out = pl.pallas_call(
        _make_ntiled_kernel(tn),
        out_shape=jax.ShapeDtypeStruct((Bp, Fp), out_dtype),
        grid_spec=pltpu.PrefetchScalarGridSpec(
            num_scalar_prefetch=0,
            grid=(nj, Bp // tb),
            in_specs=[
                pl.BlockSpec((tb, F_p), lambda j, i: (i, 0)),     # x: full K + residual
                pl.BlockSpec((tb, T), lambda j, i: (i, 0)),       # t_emb
                pl.BlockSpec((F_p, tn), lambda j, i: (0, j),      # w1^T column block
                             pipeline_mode=pl.Buffered(1)),
                pl.BlockSpec((T, tn), lambda j, i: (0, j),        # w2^T column block
                             pipeline_mode=pl.Buffered(1)),
            ],
            out_specs=pl.BlockSpec((tb, tn), lambda j, i: (i, j)),
        ),
        compiler_params=pltpu.CompilerParams(
            dimension_semantics=("parallel", "parallel"),
            vmem_limit_bytes=vmem_limit,
        ),
    )(_pad_rows(xk, Bp), _pad_rows(t_emb, Bp), w1k, w2k)
    if Bp != B or Fp != F_out:
        out = out[:B, :F_out]
    return out


# ---------------------------------------------------------------------------
# Test
# ---------------------------------------------------------------------------
def _torch_linear_init(key, out_f, in_f, dtype=jnp.float32):
    # torch.nn.Linear default init: U(-1/sqrt(in_f), 1/sqrt(in_f))
    bound = 1.0 / (in_f ** 0.5)
    return jax.random.uniform(key, (out_f, in_f), dtype, -bound, bound)


if __name__ == "__main__":
    root = jax.random.PRNGKey(0)

    # (name, B, F, T, block_n) -- second case forces the F_out-tiled path,
    # third exercises the ragged-batch padding.
    cases = [
        ("resident_weights", 64, 128, 32, None),
        ("streamed_fout",    64, 256, 32, 128),
        ("ragged_batch",     52, 128, 32, None),
    ]

    for idx, (name, B, F, T, block_n) in enumerate(cases):
        k_x, k_t, k_w1, k_w2 = jax.random.split(jax.random.fold_in(root, idx), 4)
        x = jax.random.normal(k_x, (B, F), jnp.float32)
        t_emb = jax.random.normal(k_t, (B, T), jnp.float32)
        w1 = _torch_linear_init(k_w1, F, F)   # torch layout: fc1.weight [out, in]
        w2 = _torch_linear_init(k_w2, F, T)   # torch layout: enc.weight [out, temporal]

        # one-time parameter prep (transpose + bf16 cast hoisted out of forward)
        w1_t, w2_t = init_params_from_torch_layout(w1, w2)

        out = jax.block_until_ready(
            temporal_layer(x, t_emb, w1_t, w2_t, block_n=block_n))
        assert out.shape == (B, F), name

        # strict: bf16-rounded matmul operands (kernel numerics), f32 residual
        xb  = x.astype(jnp.bfloat16).astype(jnp.float32)
        tb_ = t_emb.astype(jnp.bfloat16).astype(jnp.float32)
        w1b = w1.astype(jnp.bfloat16).astype(jnp.float32)
        w2b = w2.astype(jnp.bfloat16).astype(jnp.float32)
        ref_strict = x + jnp.maximum(xb @ w1b.T + tb_ @ w2b.T, 0.0)
        assert jnp.allclose(out.astype(jnp.float32), ref_strict,
                            atol=2e-2, rtol=2e-2), name

        # loose: full-f32 torch-semantics reference
        ref = x + jnp.maximum(x @ w1.T + t_emb @ w2.T, 0.0)
        assert jnp.allclose(out.astype(jnp.float32), ref,
                            atol=6e-2, rtol=6e-2), name

    print("KERNEL_OK")
</pallas_src>

<mosaic_0001>
module attributes {stable_mosaic.version = 11 : i64} {
  func.func @_temporal_kernel_resident(%arg0: i32, %arg1: memref<64x128xf32, #tpu.memory_space<vmem>>, %arg2: memref<64x32xf32, #tpu.memory_space<vmem>>, %arg3: memref<128x128xbf16, #tpu.memory_space<vmem>>, %arg4: memref<32x128xbf16, #tpu.memory_space<vmem>>, %arg5: memref<64x128xf32, #tpu.memory_space<vmem>>) attributes {dimension_semantics = [#tpu.dimension_semantics<parallel>], iteration_bounds = array<i64: 1>, scalar_prefetch = 0 : i64, scratch_operands = 0 : i64, tpu.core_type = #tpu.core_type<tc>, window_params = [{transform_indices = @transform_0, window_bounds = array<i64: 64, 128>}, {transform_indices = @transform_1, window_bounds = array<i64: 64, 32>}, {pipeline_mode = #tpu.pipeline_mode<synchronous>, transform_indices = @transform_2, window_bounds = array<i64: 128, 128>}, {pipeline_mode = #tpu.pipeline_mode<synchronous>, transform_indices = @transform_3, window_bounds = array<i64: 32, 128>}, {transform_indices = @transform_4, window_bounds = array<i64: 64, 128>}]} {
    %c0 = arith.constant 0 : index
    %c0_0 = arith.constant 0 : index
    %0 = vector.load %arg1[%c0, %c0_0] : memref<64x128xf32, #tpu.memory_space<vmem>>, vector<64x128xf32>
    %1 = arith.truncf %0 : vector<64x128xf32> to vector<64x128xbf16>
    %c0_1 = arith.constant 0 : index
    %c0_2 = arith.constant 0 : index
    %2 = vector.load %arg3[%c0_1, %c0_2] : memref<128x128xbf16, #tpu.memory_space<vmem>>, vector<128x128xbf16>
    %cst = arith.constant dense<0.000000e+00> : vector<64x128xf32>
    %3 = tpu.matmul %1, %2, %cst {dimension_numbers = #tpu.dot_dimension_numbers<[1], [0], [0], [1], [0, 0, 1, 1], [], []>} : vector<64x128xbf16>, vector<128x128xbf16>, vector<64x128xf32> -> vector<64x128xf32>
    %c0_3 = arith.constant 0 : index
    %c0_4 = arith.constant 0 : index
    %4 = vector.load %arg2[%c0_3, %c0_4] : memref<64x32xf32, #tpu.memory_space<vmem>>, vector<64x32xf32>
    %5 = arith.truncf %4 : vector<64x32xf32> to vector<64x32xbf16>
    %c0_5 = arith.constant 0 : index
    %c0_6 = arith.constant 0 : index
    %6 = vector.load %arg4[%c0_5, %c0_6] : memref<32x128xbf16, #tpu.memory_space<vmem>>, vector<32x128xbf16>
    %cst_7 = arith.constant dense<0.000000e+00> : vector<64x128xf32>
    %7 = tpu.matmul %5, %6, %cst_7 {dimension_numbers = #tpu.dot_dimension_numbers<[1], [0], [0], [1], [0, 0, 1, 1], [], []>} : vector<64x32xbf16>, vector<32x128xbf16>, vector<64x128xf32> -> vector<64x128xf32>
    %8 = arith.addf %3, %7 : vector<64x128xf32>
    %cst_8 = arith.constant 0.000000e+00 : f32
    %9 = vector.broadcast %cst_8 : f32 to vector<64x128xf32>
    %10 = arith.maximumf %8, %9 : vector<64x128xf32>
    %11 = arith.addf %0, %10 : vector<64x128xf32>
    %c0_9 = arith.constant 0 : index
    %c0_10 = arith.constant 0 : index
    %12 = vector.load %arg5[%c0_9, %c0_10] : memref<64x128xf32, #tpu.memory_space<vmem>>, vector<64x128xf32>
    tpu.vector_store %arg5[%c0_9, %c0_10], %11 {strides = array<i32>} : memref<64x128xf32, #tpu.memory_space<vmem>>, vector<64x128xf32>,
    return
  }
  func.func @transform_0(%arg0: i32) -> (i32, i32) {
    %c0_i32 = arith.constant 0 : i32
    %c0_i32_0 = arith.constant 0 : i32
    return %arg0, %c0_i32 : i32, i32
  }
  func.func @transform_1(%arg0: i32) -> (i32, i32) {
    %c0_i32 = arith.constant 0 : i32
    %c0_i32_0 = arith.constant 0 : i32
    return %arg0, %c0_i32 : i32, i32
  }
  func.func @transform_2(%arg0: i32) -> (i32, i32) {
    %c0_i32 = arith.constant 0 : i32
    %c0_i32_0 = arith.constant 0 : i32
    %c0_i32_1 = arith.constant 0 : i32
    return %c0_i32, %c0_i32_0 : i32, i32
  }
  func.func @transform_3(%arg0: i32) -> (i32, i32) {
    %c0_i32 = arith.constant 0 : i32
    %c0_i32_0 = arith.constant 0 : i32
    %c0_i32_1 = arith.constant 0 : i32
    return %c0_i32, %c0_i32_0 : i32, i32
  }
  func.func @transform_4(%arg0: i32) -> (i32, i32) {
    %c0_i32 = arith.constant 0 : i32
    %c0_i32_0 = arith.constant 0 : i32
    return %arg0, %c0_i32 : i32, i32
  }
}

</mosaic_0001>

<bundles_post_ra>
// kernel: tpu_custom_call.1
= control target key start
LH: loop header
LB: loop body
LE: loop exit
PB: predicated region body
PF: predicated region fallthrough
CT: control target
= control target key end

     0   :  { %9 = vsyncpa [#allocation3], 0  ;;  %s548_s0 = inlined_call_operand.vmem [shape: f32[64,128], index: 0, kind: input, shape index: {}]   ;;  %s549_s1 = inlined_call_operand.vmem [shape: f32[64,32], index: 1, kind: input, shape index: {}]   ;;  %s550_s2 = inlined_call_operand.hbm [shape: bf16[128,128], index: 2, kind: input, shape index: {}]   ;;  %s551_s3 = inlined_call_operand.vmem [shape: bf16[32,128], index: 3, kind: input, shape index: {}]   ;;  %s552_s4 = inlined_call_operand.hbm [shape: f32[64,128], index: 4, kind: output, shape index: {}]  }
   0x1   :  { %10 = vsyncpa [#allocation4], 0  ;;  %s449_s15 = smov [#allocation2]  }
   0x2   :  { %s20_s16 = sshll.u32 %s449_s15, 4  ;;  %s21_s16 = int_to_ptr.vmem [resolvable:$true] %s20_s16 }
   0x3   :  { %s413_s17 = scalar_lea.vmem %s21_s16, 1024  ;;  %p418_p1 = scmp.lt.s32.totalorder %s21_s16, %s21_s16 }
   0x4   :  { %p414_p0 = scmp.ne.s32.totalorder %s21_s16, %s413_s17  ;;  %p419_p2 = scmp.lt.s32.totalorder %s413_s17, %s413_s17 }
   0x6   :  { %p420_p3 = por %p419_p2, %p418_p1 }
   0x8   :  { %p421_p4 = pnand %p420_p3, %p414_p0 }
   0xa   :  { %424 = shalt.err (!%p421_p4)
}
   0xb   :  { %s450_s18 = smov 64   ;;  %s451_s19 = smov 4  }
   0xc   :  { %26 = dma.hbm_to_vmem [thread:$0]  %s550_s2, 1024, %s21_s16, [#allocation3], %s450_s18, %s450_s18, %s451_s19  }
   0xd   :  { %445 = dma.done.wait [#allocation3], 1024  }
   0xe   :  { %446 = vsyncadd [#allocation3], 4294966272  ;;  %v395_v0 = vld [vmem:[#allocation2 + $0x38] sm:$0xff]   ;;  %v396_v1 = vld [vmem:[#allocation2 + $0x30] sm:$0xff]   ;;  %vm89_vm0 = vcmask 261120  }
   0xf   :  { %365 = vmatprep.subr.bf16.mxu1 %v395_v0  ;;  %v397_v2 = vld [vmem:[#allocation2 + $0x28] sm:$0xff]   ;;  %v402_v4 = vld [vmem:[%s551_s3] sm:$0xff]   ;;  %v63_v8 = vld [vmem:[%s549_s1 + $0x10] sm:$0xff] }
  0x10   :  { %366 = vmatpush3.bf16.msra.mxu1 %v395_v0  ;;  %v400_v3 = vld [vmem:[%s551_s3 + $0x8] sm:$0xff]   ;;  %v398_v5 = vld [vmem:[#allocation2 + $0x20] sm:$0xff]   ;;  %v64_v10 = vld [vmem:[%s549_s1 + $0x18] sm:$0xff] }
  0x11   :  { %367 = vmatprep.subr.bf16.mxu1 %v396_v1  ;;  %353 = vmatprep.subr.bf16.mxu0 %v400_v3  ;;  %v61_v6 = vld [vmem:[%s549_s1] sm:$0xff]  ;;  %v62_v7 = vld [vmem:[%s549_s1 + $0x8] sm:$0xff]  ;;  %v70_v11 = vpack.c.bf16 %v64_v10, %v63_v8  ;;  %v399_v14 = vld [vmem:[#allocation2 + $0x18] sm:$0xff]  }
  0x12   :  { %354 = vmatpush3.bf16.msra.mxu0 %v400_v3  ;;  %v69_v9 = vpack.c.bf16 %v62_v7, %v61_v6  ;;  %v33_v12 = vld [vmem:[%s548_s0] sm:$0xff]  ;;  %v507_v13 = vld [vmem:[%s548_s0 + $0x8] sm:$0xff]  ;;  %v401_v19 = vld [vmem:[#allocation2 + $0x10] sm:$0xff]  }
  0x13   :  { %355 = vmatprep.subr.bf16.mxu0 %v402_v4  ;;  %v41_v15 = vpack.c.bf16 %v507_v13, %v33_v12  ;;  %v65_v16 = vld [vmem:[%s549_s1 + $0x20] sm:$0xff]  ;;  %v66_v17 = vld [vmem:[%s549_s1 + $0x28] sm:$0xff]  ;;  %v67_v20 = vld [vmem:[%s549_s1 + $0x30] sm:$0xff] }
  0x14   :  { %368 = vmatpush3.bf16.msra.mxu1 %v396_v1  ;;  %357 = vmatprep.mubr.msk.bf16.mxu0 %vm89_vm0, %v69_v9  ;;  %v71_v18 = vpack.c.bf16 %v66_v17, %v65_v16  ;;  %v68_v21 = vld [vmem:[%s549_s1 + $0x38] sm:$0xff]  ;;  %v403_v23 = vld [vmem:[#allocation2 + $0x8] sm:$0xff]   ;;  %v404_v24 = vld [vmem:[#allocation2] sm:$0xff]  }
  0x15   :  { %369 = vmatprep.subr.bf16.mxu1 %v397_v2  ;;  %381 = vmatprep.mubr.bf16.mxu1 %v41_v15  ;;  %v72_v22 = vpack.c.bf16 %v68_v21, %v67_v20  ;;  %v35_v25 = vld [vmem:[%s548_s0 + $0x10] sm:$0xff]  ;;  %v36_v26 = vld [vmem:[%s548_s0 + $0x18] sm:$0xff]  ;;  %v37_v27 = vld [vmem:[%s548_s0 + $0x20] sm:$0xff] }
  0x16   :  { %356 = vmatpush3.bf16.msra.mxu0 %v402_v4  ;;  %v38_v28 = vld [vmem:[%s548_s0 + $0x28] sm:$0xff]  ;;  %v42_v29 = vpack.c.bf16 %v36_v26, %v35_v25  ;;  %v39_v31 = vld [vmem:[%s548_s0 + $0x30] sm:$0xff]  ;;  %v40_v32 = vld [vmem:[%s548_s0 + $0x38] sm:$0xff]  ;;  %s452_s0 = smov [#allocation5]  }
  0x17   :  { %v43_v30 = vpack.c.bf16 %v38_v28, %v37_v27  ;;  %v44_v33 = vpack.c.bf16 %v40_v32, %v39_v31  ;;  %s309_s28 = sshll.u32 %s452_s0, 4  ;;  %s310_s28 = int_to_ptr.vmem [resolvable:$true] %s309_s28 }
  0x18   :  { %370 = vmatpush3.bf16.msra.mxu1 %v397_v2  ;;  %s425_s29 = scalar_lea.vmem %s310_s28, 1024  ;;  %p430_p6 = scmp.lt.s32.totalorder %s310_s28, %s310_s28 }
  0x19   :  { %371 = vmatprep.subr.bf16.mxu1 %v398_v5  ;;  %358 = vmatmul.mubr.msk.bf16.vlgmr.msra.gmra.mxu0 %vm89_vm0, %v70_v11  ;;  %p426_p5 = scmp.ne.s32.totalorder %s310_s28, %s425_s29  ;;  %p431_p7 = scmp.lt.s32.totalorder %s425_s29, %s425_s29 }
  0x1a   :  { %361 = vmatprep.mubr.msk.bf16.mxu0 %vm89_vm0, %v71_v18 }
  0x1b   :  { %p432_p8 = por %p431_p7, %p430_p6 }
  0x1c   :  { %372 = vmatpush3.bf16.msra.mxu1 %v398_v5 }
  0x1d   :  { %373 = vmatprep.subr.bf16.mxu1 %v399_v14  ;;  %p433_p9 = pnand %p432_p8, %p426_p5 }
  0x20   :  { %374 = vmatpush3.bf16.msra.mxu1 %v399_v14 }
  0x21   :  { %375 = vmatprep.subr.bf16.mxu1 %v401_v19  ;;  %362 = vmatmul.mubr.msk.bf16.gmra.mxu0 %vm89_vm0, %v72_v22 }
  0x24   :  { %376 = vmatpush3.bf16.msra.mxu1 %v401_v19 }
  0x25   :  { %377 = vmatprep.subr.bf16.mxu1 %v403_v23 }
  0x28   :  { %378 = vmatpush3.bf16.msra.mxu1 %v403_v23 }
  0x29   :  { %379 = vmatprep.subr.bf16.mxu1 %v404_v24 }
  0x2c   :  { %380 = vmatpush3.bf16.msra.mxu1 %v404_v24 }
  0x2f   :  { %382 = vmatmul.mubr.bf16.vlgmr.msra.gmra.mxu1 %v42_v29 }
  0x30   :  { %385 = vmatprep.mubr.bf16.mxu1 %v43_v30 }
  0x37   :  { %386 = vmatmul.mubr.bf16.gmra.mxu1 %v44_v33 }
  0xd9   :  { %v359_v34 = vpop.f32.mrf.mxu0 }
  0xdb   :  { %v136_v35 = vpop.f32.mrf.mxu0 }
  0xdd   :  { %v360_v36 = vpop.f32.mrf.mxu0 }
  0xdf   :  { %v139_v37 = vpop.f32.mrf.mxu0 }
  0xe1   :  { %v363_v40 = vpop.f32.mrf.mxu0 }
  0xe3   :  { %v152_v48 = vpop.f32.mrf.mxu0 }
  0xe5   :  { %v364_v57 = vpop.f32.mrf.mxu0 }
  0xe7   :  { %v155_v2 = vpop.f32.mrf.mxu0 }
  0xef   :  { %v383_v38 = vpop.f32.mrf.mxu1 }
  0xf0   :  { %v258_v39 = vadd.f32 %v383_v38, %v359_v34 }
  0xf1   :  { %v249_v41 = vpop.f32.mrf.mxu1 }
  0xf2   :  { %v282_v42 = vmax.f32 %v258_v39, 0.0  ;;  %v250_v43 = vadd.f32 %v249_v41, %v136_v35 }
  0xf3   :  { %v384_v44 = vpop.f32.mrf.mxu1 }
  0xf4   :  { %v290_v45 = vadd.f32 %v282_v42, %v35_v25  ;;  %v280_v46 = vmax.f32 %v250_v43, 0.0  ;;  %v261_v47 = vadd.f32 %v384_v44, %v360_v36 }
  0xf5   :  { %v252_v49 = vpop.f32.mrf.mxu1 }
  0xf6   :  { %298 = vst [vmem:[#allocation5 + $0x10] sm:$0xff] %v290_v45  ;;  %v288_v50 = vadd.f32 %v280_v46, %v33_v12  ;;  %v283_v51 = vmax.f32 %v261_v47, 0.0  ;;  %v253_v52 = vadd.f32 %v252_v49, %v139_v37 }
  0xf7   :  { %v387_v53 = vpop.f32.mrf.mxu1 }
  0xf8   :  { %296 = vst [vmem:[#allocation5] sm:$0xff] %v288_v50  ;;  %v291_v54 = vadd.f32 %v283_v51, %v36_v26  ;;  %v281_v55 = vmax.f32 %v253_v52, 0.0  ;;  %v274_v56 = vadd.f32 %v387_v53, %v363_v40 }
  0xf9   :  { %v265_v58 = vpop.f32.mrf.mxu1 }
  0xfa   :  { %299 = vst [vmem:[#allocation5 + $0x18] sm:$0xff] %v291_v54  ;;  %v289_v59 = vadd.f32 %v281_v55, %v507_v13  ;;  %v286_v60 = vmax.f32 %v274_v56, 0.0  ;;  %v266_v61 = vadd.f32 %v265_v58, %v152_v48 }
  0xfb   :  { %v388_v62 = vpop.f32.mrf.mxu1 }
  0xfc   :  { %297 = vst [vmem:[#allocation5 + $0x8] sm:$0xff] %v289_v59  ;;  %v294_v63 = vadd.f32 %v286_v60, %v39_v31  ;;  %v284_v0 = vmax.f32 %v266_v61, 0.0  ;;  %v277_v1 = vadd.f32 %v388_v62, %v364_v57 }
  0xfd   :  { %v268_v3 = vpop.f32.mrf.mxu1 }
  0xfe   :  { %302 = vst [vmem:[#allocation5 + $0x30] sm:$0xff] %v294_v63  ;;  %v292_v4 = vadd.f32 %v284_v0, %v37_v27  ;;  %v287_v5 = vmax.f32 %v277_v1, 0.0  ;;  %v269_v6 = vadd.f32 %v268_v3, %v155_v2 }
 0x100   :  { %300 = vst [vmem:[#allocation5 + $0x20] sm:$0xff] %v292_v4  ;;  %v295_v7 = vadd.f32 %v287_v5, %v40_v32  ;;  %v285_v8 = vmax.f32 %v269_v6, 0.0 }
 0x102   :  { %303 = vst [vmem:[#allocation5 + $0x38] sm:$0xff] %v295_v7  ;;  %v293_v9 = vadd.f32 %v285_v8, %v38_v28 }
 0x104   :  { %301 = vst [vmem:[#allocation5 + $0x28] sm:$0xff] %v293_v9 }
 0x105   :  { %436 = shalt.err (!%p433_p9)
}
 0x106   :  { %s453_s30 = smov 128   ;;  %s454_s5 = smov 8  }
 0x107   :  { %315 = dma.vmem_to_hbm [thread:$0]  %s310_s28, 1024, %s552_s4, [#allocation4], %s453_s30, %s453_s30, %s454_s5  }
 0x108   :  { %447 = dma.done.wait [#allocation4], 1024  }
 0x109   :  { %448 = vsyncadd [#allocation4], 4294966272 }
 0x10a   :  { %319 = vsyncpa [#allocation3], 1 }
 0x10b   :  { %320 = vsyncpa [#allocation4], 1 }

</bundles_post_ra>
